<compile_context>
chip_gen: v6e
topology: v6e:2x2x1
jax: 0.10.0
libtpu: 0.0.40
codegen_flags: <defaults>
</compile_context>

<pallas_src>
import jax
import jax.numpy as jnp
from jax.experimental import pallas as pl
from jax.experimental.pallas import tpu as pltpu

_LANE = 128          # TPU lane width (last dim of a vreg)
_SUBLANE_BF16 = 16   # bf16 packs 16 rows per vreg -> batch tiles multiple of 16


def _round_up(x, m):
    return ((x + m - 1) // m) * m


def _choose_block_m(batch):
    """Batch-tile size: multiple of 16, target ~512 rows, and >= 2 grid steps
    when the batch allows it (pipelining + v7x megacore)."""
    if batch <= 2 * _SUBLANE_BF16:
        # Too small to split; single tile padded to a legal sublane multiple.
        return _round_up(max(batch, _SUBLANE_BF16), _SUBLANE_BF16)
    half = _round_up(-(-batch // 2), _SUBLANE_BF16)   # ceil(batch/2) -> >=2 steps
    return min(512, half)


def _mlp_kernel(x_ref, w1_ref, b1_ref, w2_ref, b2_ref, o_ref):
    """relu(x @ w1 + b1) @ w2 + b2, fused in one body.

    x_ref/w1_ref/w2_ref are bf16 (native MXU); accumulation + epilogue in f32.
    """
    # Layer 1: MXU matmul (bf16 in, f32 accumulate) + f32 bias/ReLU on the VPU.
    h = jnp.dot(x_ref[...], w1_ref[...], preferred_element_type=jnp.float32)
    h = jnp.maximum(h + b1_ref[...], 0.0)
    # Layer 2: activation is explicitly downcast to bf16 to stay on the native
    # MXU path (tiny, accepted deviation from an all-f32 reference).
    o = jnp.dot(h.astype(jnp.bfloat16), w2_ref[...],
                preferred_element_type=jnp.float32)
    o_ref[...] = (o + b2_ref[...]).astype(o_ref.dtype)


def graph_cellular_automata(x, w1, b1, w2, b2, *, block_m=None):
    """Fused MLP forward: relu(x @ w1 + b1) @ w2 + b2.

    x  : (batch, input_dim)
    w1 : (input_dim, hidden_dim)   b1 : (hidden_dim,)
    w2 : (hidden_dim, output_dim)  b2 : (output_dim,)
    """
    batch, input_dim = x.shape
    hidden_dim = w1.shape[1]
    output_dim = w2.shape[1]
    out_dtype = x.dtype

    if block_m is None:
        block_m = _choose_block_m(batch)
    assert block_m % _SUBLANE_BF16 == 0, "block_m must be a multiple of 16 (bf16 tiles)"

    padded_batch = _round_up(batch, block_m)
    n_pad = _round_up(output_dim, _LANE)          # lane-dense output store

    # ---- wrapper-side dtype / padding plumbing (layout, not compute) ----
    x_b = x.astype(jnp.bfloat16)
    if padded_batch != batch:
        x_b = jnp.pad(x_b, ((0, padded_batch - batch), (0, 0)))
    w1_b = w1.astype(jnp.bfloat16)
    w2_b = jnp.pad(w2, ((0, 0), (0, n_pad - output_dim))).astype(jnp.bfloat16)
    b1_2d = b1.reshape(1, hidden_dim).astype(jnp.float32)
    b2_2d = jnp.pad(b2, (0, n_pad - output_dim)).reshape(1, n_pad).astype(jnp.float32)

    grid = (padded_batch // block_m,)

    out = pl.pallas_call(
        _mlp_kernel,
        out_shape=jax.ShapeDtypeStruct((padded_batch, n_pad), jnp.float32),
        grid_spec=pl.GridSpec(
            grid=grid,
            in_specs=[
                # x: tile the batch dim; feature dim stays whole (== full array dim)
                pl.BlockSpec((block_m, input_dim), lambda i: (i, 0)),
                # weights & biases: constant index_map -> resident across grid steps
                pl.BlockSpec((input_dim, hidden_dim), lambda i: (0, 0)),
                pl.BlockSpec((1, hidden_dim), lambda i: (0, 0)),
                pl.BlockSpec((hidden_dim, n_pad), lambda i: (0, 0)),
                pl.BlockSpec((1, n_pad), lambda i: (0, 0)),
            ],
            out_specs=pl.BlockSpec((block_m, n_pad), lambda i: (i, 0)),
        ),
        compiler_params=pltpu.CompilerParams(
            dimension_semantics=("parallel",)),   # batch axis: v7x megacore shard
    )(x_b, w1_b, b1_2d, w2_b, b2_2d)

    return out[:batch, :output_dim].astype(out_dtype)


def _reference(x, w1, b1, w2, b2):
    h = jnp.maximum(x @ w1 + b1, 0.0)
    return h @ w2 + b2


if __name__ == "__main__":
    # Shapes implied by the module: x is (num_nodes, input_dim).
    # 256 nodes -> block_m=128, grid=(2,): exercises pipelining / both TCs on v7x.
    batch, input_dim, hidden_dim, output_dim = 256, 16, 32, 16

    key = jax.random.PRNGKey(0)
    k_x, k_w1, k_b1, k_w2, k_b2 = jax.random.split(key, 5)

    x = jax.random.normal(k_x, (batch, input_dim), dtype=jnp.float32)
    # Deterministic synthetic parameters (not a checkpoint load).
    w1 = jax.random.normal(k_w1, (input_dim, hidden_dim), jnp.float32) * 0.1
    b1 = jax.random.normal(k_b1, (hidden_dim,), jnp.float32) * 0.1
    w2 = jax.random.normal(k_w2, (hidden_dim, output_dim), jnp.float32) * 0.1
    b2 = jax.random.normal(k_b2, (output_dim,), jnp.float32) * 0.1

    out = graph_cellular_automata(x, w1, b1, w2, b2)
    out = jax.block_until_ready(out)

    ref = _reference(x, w1, b1, w2, b2)
    assert out.shape == (batch, output_dim)
    # bf16 MXU inputs -> slightly looser tolerance than an all-f32 path.
    assert jnp.allclose(out, ref, atol=2e-2, rtol=2e-2), "mismatch vs reference"

    print("KERNEL_OK")
</pallas_src>

<mosaic_0001>
module attributes {stable_mosaic.version = 11 : i64} {
  func.func @_mlp_kernel(%arg0: i32, %arg1: memref<128x16xbf16, #tpu.memory_space<vmem>>, %arg2: memref<16x32xbf16, #tpu.memory_space<vmem>>, %arg3: memref<1x32xf32, #tpu.memory_space<vmem>>, %arg4: memref<32x128xbf16, #tpu.memory_space<vmem>>, %arg5: memref<1x128xf32, #tpu.memory_space<vmem>>, %arg6: memref<128x128xf32, #tpu.memory_space<vmem>>) attributes {dimension_semantics = [#tpu.dimension_semantics<parallel>], iteration_bounds = array<i64: 2>, scalar_prefetch = 0 : i64, scratch_operands = 0 : i64, tpu.core_type = #tpu.core_type<tc>, window_params = [{transform_indices = @transform_0, window_bounds = array<i64: 128, 16>}, {pipeline_mode = #tpu.pipeline_mode<synchronous>, transform_indices = @transform_1, window_bounds = array<i64: 16, 32>}, {pipeline_mode = #tpu.pipeline_mode<synchronous>, transform_indices = @transform_2, window_bounds = array<i64: 1, 32>}, {pipeline_mode = #tpu.pipeline_mode<synchronous>, transform_indices = @transform_3, window_bounds = array<i64: 32, 128>}, {pipeline_mode = #tpu.pipeline_mode<synchronous>, transform_indices = @transform_4, window_bounds = array<i64: 1, 128>}, {transform_indices = @transform_5, window_bounds = array<i64: 128, 128>}]} {
    %c0 = arith.constant 0 : index
    %c0_0 = arith.constant 0 : index
    %0 = vector.load %arg1[%c0, %c0_0] : memref<128x16xbf16, #tpu.memory_space<vmem>>, vector<128x16xbf16>
    %c0_1 = arith.constant 0 : index
    %c0_2 = arith.constant 0 : index
    %1 = vector.load %arg2[%c0_1, %c0_2] : memref<16x32xbf16, #tpu.memory_space<vmem>>, vector<16x32xbf16>
    %cst = arith.constant dense<0.000000e+00> : vector<128x32xf32>
    %2 = tpu.matmul %0, %1, %cst {dimension_numbers = #tpu.dot_dimension_numbers<[1], [0], [0], [1], [0, 0, 1, 1], [], []>} : vector<128x16xbf16>, vector<16x32xbf16>, vector<128x32xf32> -> vector<128x32xf32>
    %c0_3 = arith.constant 0 : index
    %c0_4 = arith.constant 0 : index
    %3 = vector.load %arg3[%c0_3, %c0_4] : memref<1x32xf32, #tpu.memory_space<vmem>>, vector<1x32xf32>
    %4 = vector.broadcast %3 : vector<1x32xf32> to vector<128x32xf32>
    %5 = arith.addf %2, %4 : vector<128x32xf32>
    %cst_5 = arith.constant 0.000000e+00 : f32
    %6 = vector.broadcast %cst_5 : f32 to vector<128x32xf32>
    %7 = arith.maximumf %5, %6 : vector<128x32xf32>
    %8 = arith.truncf %7 : vector<128x32xf32> to vector<128x32xbf16>
    %c0_6 = arith.constant 0 : index
    %c0_7 = arith.constant 0 : index
    %9 = vector.load %arg4[%c0_6, %c0_7] : memref<32x128xbf16, #tpu.memory_space<vmem>>, vector<32x128xbf16>
    %cst_8 = arith.constant dense<0.000000e+00> : vector<128x128xf32>
    %10 = tpu.matmul %8, %9, %cst_8 {dimension_numbers = #tpu.dot_dimension_numbers<[1], [0], [0], [1], [0, 0, 1, 1], [], []>} : vector<128x32xbf16>, vector<32x128xbf16>, vector<128x128xf32> -> vector<128x128xf32>
    %c0_9 = arith.constant 0 : index
    %c0_10 = arith.constant 0 : index
    %11 = vector.load %arg5[%c0_9, %c0_10] : memref<1x128xf32, #tpu.memory_space<vmem>>, vector<1x128xf32>
    %12 = vector.broadcast %11 : vector<1x128xf32> to vector<128x128xf32>
    %13 = arith.addf %10, %12 : vector<128x128xf32>
    %c0_11 = arith.constant 0 : index
    %c0_12 = arith.constant 0 : index
    %14 = vector.load %arg6[%c0_11, %c0_12] : memref<128x128xf32, #tpu.memory_space<vmem>>, vector<128x128xf32>
    tpu.vector_store %arg6[%c0_11, %c0_12], %13 {strides = array<i32>} : memref<128x128xf32, #tpu.memory_space<vmem>>, vector<128x128xf32>,
    return
  }
  func.func @transform_0(%arg0: i32) -> (i32, i32) {
    %c0_i32 = arith.constant 0 : i32
    %c0_i32_0 = arith.constant 0 : i32
    return %arg0, %c0_i32 : i32, i32
  }
  func.func @transform_1(%arg0: i32) -> (i32, i32) {
    %c0_i32 = arith.constant 0 : i32
    %c0_i32_0 = arith.constant 0 : i32
    %c0_i32_1 = arith.constant 0 : i32
    return %c0_i32, %c0_i32_0 : i32, i32
  }
  func.func @transform_2(%arg0: i32) -> (i32, i32) {
    %c0_i32 = arith.constant 0 : i32
    %c0_i32_0 = arith.constant 0 : i32
    %c0_i32_1 = arith.constant 0 : i32
    return %c0_i32, %c0_i32_0 : i32, i32
  }
  func.func @transform_3(%arg0: i32) -> (i32, i32) {
    %c0_i32 = arith.constant 0 : i32
    %c0_i32_0 = arith.constant 0 : i32
    %c0_i32_1 = arith.constant 0 : i32
    return %c0_i32, %c0_i32_0 : i32, i32
  }
  func.func @transform_4(%arg0: i32) -> (i32, i32) {
    %c0_i32 = arith.constant 0 : i32
    %c0_i32_0 = arith.constant 0 : i32
    %c0_i32_1 = arith.constant 0 : i32
    return %c0_i32, %c0_i32_0 : i32, i32
  }
  func.func @transform_5(%arg0: i32) -> (i32, i32) {
    %c0_i32 = arith.constant 0 : i32
    %c0_i32_0 = arith.constant 0 : i32
    return %arg0, %c0_i32 : i32, i32
  }
}

</mosaic_0001>

<bundles_post_ra>
// kernel: tpu_custom_call.1
= control target key start
LH: loop header
LB: loop body
LE: loop exit
PB: predicated region body
PF: predicated region fallthrough
CT: control target
= control target key end

     0   :  { %10 = vsyncpa [#allocation3], 0  ;;  %s1082_s0 = inlined_call_operand.vmem [shape: bf16[256,16], index: 0, kind: input, shape index: {}]   ;;  %s1083_s1 = inlined_call_operand.vmem [shape: bf16[16,32], index: 1, kind: input, shape index: {}]   ;;  %s1084_s2 = inlined_call_operand.vmem [shape: f32[1,32], index: 2, kind: input, shape index: {}]   ;;  %s1085_s3 = inlined_call_operand.vmem [shape: bf16[32,128], index: 3, kind: input, shape index: {}]   ;;  %s1086_s4 = inlined_call_operand.vmem [shape: f32[1,128], index: 4, kind: input, shape index: {}]   ;;  %s1087_s5 = inlined_call_operand.hbm [shape: f32[256,128], index: 5, kind: output, shape index: {}]  }
   0x1   :  { %12 = vsyncpa [#allocation3 + $0x1], 0  ;;  %s927_s18 = smov 0   ;;  %s929_s19 = smov 0  }
   0x2   :  { %s931_s20 = smov 0   ;;  %s933_s21 = smov 0  }
   0x3 LB: > { %s948_s22 = sadd.s32 4294967295, %s892_s21   ;;  %s681_s23 = sadd.s32 4294967294, %s892_s21   ;;  %s892_s21 = sphi %s933_s21, %s1093_s21   ;;  %s888_s20 = sphi %s931_s20, %s1092_s20   ;;  %s884_s19 = sphi %s929_s19, %s1091_s19   ;;  %s880_s18 = sphi %s927_s18, %s1090_s18  }
   0x4   : > { %s952_s24 = sadd.s32 1, %s892_s21   ;;  %s135_s25 = sadd.s32 1, %s888_s20 }
   0x5   : > { %s132_s26 = ssub.s32 %s892_s21, %s952_s24  ;;  %p145_p0 = scmp.ne.s32.totalorder %s888_s20, %s884_s19 }
   0x6   : > { %p133_p1 = scmp.eq.s32.totalorder %s132_s26, 0  ;;  %p146_p2 = scmp.eq.s32.totalorder %s948_s22, 1 }
   0x7   : > { %p151_p3 = scmp.ne.s32.totalorder %s884_s19, %s880_s18  ;;  %p152_p4 = scmp.eq.s32.totalorder %s681_s23, 1 }
   0x8   : > { %s963_s27 = scalar_select %p133_p1, %s888_s20, %s135_s25  }
   0x9   : > { %p965_p5 = por %p146_p2, %p145_p0  ;;  %p969_p6 = por %p152_p4, %p151_p3 }
   0xa   : > { %p684_p7 = scmp.ge.s32.totalorder %s892_s21, 1  ;;  %p191_p8 = scmp.lt.s32.totalorder %s892_s21, 3 }
   0xc   : > { %p192_p9 = pnand %p684_p7, %p191_p8 }
   0xd   : > { %s686_s7 = sshll.u32 (!%p192_p9), %s948_s22, 4  ;;  %s216_s23 = sand.u32 (!%p192_p9), 1, %s884_s19  }
   0xe   : > { %195 = sbr.rel (%p192_p9) target bundleno = 469 (0x1d5), region = 40  ;;  %p220_p10 = scmp.lt.s32.totalorder (!%p192_p9), %s686_s7, 31 }
   0xf   : > { %s685_s25 = sshll.u32 (!%p192_p9), %s216_s23, 7  ;;  %s894_s13 = smov (!%p192_p9), [#allocation2]  }
  0x10   : > { %s1013_s6 = scalar_lea.vmem (!%p192_p9), [#allocation2], %s685_s25  ;;  %s836_s14 = sshll.u32 (!%p192_p9), %s894_s13, 4  ;;  %s837_s14 = int_to_ptr.vmem [resolvable:$false] %s836_s14 }
  0x11   : > { %s838_s15 = scalar_lea.vmem (!%p192_p9), %s837_s14, 4096 }
  0x13   : > { %v821_v0 = vld [vmem:[%s1083_s1] sm:$0xff]   ;;  %s1095_s7 = smov (!%p220_p10, %s686_s7), 31  ;;  %vm298_vm0 = vcmask 130048   ;;  %v830_v9 = vld [vmem:[%s1085_s3 + $0x8] sm:$0xff]   ;;  %vm467_vm1 = vcmask 261120  }
  0x14   : > { %742 = vmatprep.subr.bf16.mxu0 %v821_v0  ;;  %s687_s8 = sshll.u32 %s1095_s7, 2  ;;  %760 = vmatprep.subr.bf16.mxu1 %v830_v9  ;;  %v831_v10 = vld [vmem:[%s1085_s3] sm:$0xff]   ;;  %s722_s7 = sshll.u32 %s948_s22, 11 }
  0x15   : > { %743 = vmatpush3.bf16.msra.mxu0 %v821_v0  ;;  %s223_s11 = scalar_lea.vmem %s1082_s0, %s687_s8  ;;  %761 = vmatpush3.bf16.msra.mxu1 %v830_v9  ;;  %v688_v13 = vld [vmem:[%s1084_s2] ss:$0 sm:$0xff]  ;;  %s619_s8 = sshll.u32 %s1013_s6, 4  ;;  %s1036_s8 = int_to_ptr.vmem [resolvable:$true] %s619_s8 }
  0x16   : > { %v822_v1 = vld [vmem:[%s223_s11] sm:$0xff]   ;;  %v823_v2 = vld [vmem:[%s223_s11 + $0x8] sm:$0xff]   ;;  %v824_v3 = vld [vmem:[%s223_s11 + $0x10] sm:$0xff]   ;;  %762 = vmatprep.subr.bf16.mxu1 %v831_v10  ;;  %s1042_s22 = scalar_lea.sflag [#allocation3], %s216_s23  ;;  %s832_s12 = scalar_lea.vmem %s1036_s8, 2048 }
  0x17   : > { %744 = vmatprep.mubr.msk.bf16.mxu0 %vm298_vm0, %v822_v1  ;;  %v825_v4 = vld [vmem:[%s223_s11 + $0x18] sm:$0xff]   ;;  %v826_v5 = vld [vmem:[%s223_s11 + $0x20] sm:$0xff]   ;;  %v827_v6 = vld [vmem:[%s223_s11 + $0x28] sm:$0xff]   ;;  %p833_p11 = scmp.ne.s32.totalorder %s1036_s8, %s832_s12  ;;  %p839_p0 = scmp.lt.s32.totalorder %s1036_s8, %s837_s14 }
  0x18   : > { %745 = vmatmul.mubr.msk.bf16.vlgmr.msra.gmra.mxu0 %vm298_vm0, %v823_v2  ;;  %v828_v7 = vld [vmem:[%s223_s11 + $0x30] sm:$0xff]   ;;  %v829_v8 = vld [vmem:[%s223_s11 + $0x38] sm:$0xff]   ;;  %s1034_s11 = scalar_lea.hbm %s1087_s5, %s722_s7  ;;  %p840_p1 = scmp.lt.s32.totalorder %s838_s15, %s832_s12 }
  0x19   : > { %748 = vmatprep.mubr.msk.bf16.mxu0 %vm298_vm0, %v824_v3  ;;  %763 = vmatpush3.bf16.msra.mxu1 %v831_v10  ;;  %p834_p12 = pnand %p833_p11, %p965_p5 }
  0x1a   : > { %p841_p2 = por %p840_p1, %p839_p0 }
  0x1b   : > { %p835_p13 = pneg %p834_p12 }
  0x1d   : > { %p842_p3 = pnand %p841_p2, %p835_p13 }
  0x20   : > { %749 = vmatmul.mubr.msk.bf16.gmra.mxu0 %vm298_vm0, %v825_v4  ;;  %v706_v4 = vld [vmem:[%s1086_s4] ss:$0 sm:$0xff] }
  0x21   : > { %752 = vmatprep.mubr.msk.bf16.mxu0 %vm298_vm0, %v826_v5 }
  0x28   : > { %753 = vmatmul.mubr.msk.bf16.gmra.mxu0 %vm298_vm0, %v827_v6 }
  0x29   : > { %756 = vmatprep.mubr.msk.bf16.mxu0 %vm298_vm0, %v828_v7 }
  0x30   : > { %757 = vmatmul.mubr.msk.bf16.gmra.mxu0 %vm298_vm0, %v829_v8 }
  0xd8   : > { %v746_v11 = vpop.f32.mrf.mxu0 }
  0xd9   : > { %v366_v17 = vadd.f32 %v746_v11, %v688_v13 }
  0xda   : > { %v357_v12 = vpop.f32.mrf.mxu0 }
  0xdb   : > { %v358_v15 = vadd.f32 %v688_v13, %v357_v12  ;;  %v422_v24 = vmax.f32 %v366_v17, 0.0 }
  0xdc   : > { %v747_v14 = vpop.f32.mrf.mxu0 }
  0xdd   : > { %v369_v16 = vadd.f32 %v747_v14, %v688_v13  ;;  %v420_v22 = vmax.f32 %v358_v15, 0.0 }
  0xde   : > { %v360_v18 = vpop.f32.mrf.mxu0 }
  0xdf   : > { %v361_v19 = vadd.f32 %v688_v13, %v360_v18  ;;  %v423_v20 = vmax.f32 %v369_v16, 0.0 }
  0xe0   : > { %v750_v21 = vpop.f32.mrf.mxu0 }
  0xe1   : > { %v421_v23 = vmax.f32 %v361_v19, 0.0  ;;  %v437_v27 = vpack.c.bf16 %v423_v20, %v422_v24  ;;  %v382_v31 = vadd.f32 %v750_v21, %v688_v13 }
  0xe2   : > { %v373_v25 = vpop.f32.mrf.mxu0 }
  0xe3   : > { %v436_v26 = vpack.c.bf16 %v421_v23, %v420_v22  ;;  %v374_v29 = vadd.f32 %v688_v13, %v373_v25  ;;  %v426_v38 = vmax.f32 %v382_v31, 0.0 }
  0xe4   : > { %v751_v28 = vpop.f32.mrf.mxu0 }
  0xe5   : > { %v385_v30 = vadd.f32 %v751_v28, %v688_v13  ;;  %764 = vmatprep.mubr.msk.bf16.mxu1 %vm467_vm1, %v436_v26  ;;  %v424_v36 = vmax.f32 %v374_v29, 0.0 }
  0xe6   : > { %v376_v32 = vpop.f32.mrf.mxu0  ;;  %765 = vmatmul.mubr.msk.bf16.vlgmr.msra.gmra.mxu1 %vm467_vm1, %v437_v27 }
  0xe7   : > { %v377_v33 = vadd.f32 %v688_v13, %v376_v32  ;;  %v427_v34 = vmax.f32 %v385_v30, 0.0 }
  0xe8   : > { %v754_v35 = vpop.f32.mrf.mxu0 }
  0xe9   : > { %v425_v37 = vmax.f32 %v377_v33, 0.0  ;;  %v439_v41 = vpack.c.bf16 %v427_v34, %v426_v38  ;;  %v398_v45 = vadd.f32 %v754_v35, %v688_v13 }
  0xea   : > { %v389_v39 = vpop.f32.mrf.mxu0 }
  0xeb   : > { %v438_v40 = vpack.c.bf16 %v425_v37, %v424_v36  ;;  %v390_v43 = vadd.f32 %v688_v13, %v389_v39  ;;  %v430_v52 = vmax.f32 %v398_v45, 0.0 }
  0xec   : > { %v755_v42 = vpop.f32.mrf.mxu0 }
  0xed   : > { %v401_v44 = vadd.f32 %v755_v42, %v688_v13  ;;  %768 = vmatprep.mubr.msk.bf16.mxu1 %vm467_vm1, %v438_v40  ;;  %v428_v50 = vmax.f32 %v390_v43, 0.0 }
  0xee   : > { %v392_v46 = vpop.f32.mrf.mxu0  ;;  %769 = vmatmul.mubr.msk.bf16.gmra.mxu1 %vm467_vm1, %v439_v41 }
  0xef   : > { %v393_v47 = vadd.f32 %v688_v13, %v392_v46  ;;  %v431_v48 = vmax.f32 %v401_v44, 0.0 }
  0xf0   : > { %v758_v49 = vpop.f32.mrf.mxu0 }
  0xf1   : > { %v429_v51 = vmax.f32 %v393_v47, 0.0  ;;  %v441_v55 = vpack.c.bf16 %v431_v48, %v430_v52  ;;  %v414_v59 = vadd.f32 %v758_v49, %v688_v13 }
  0xf2   : > { %v405_v53 = vpop.f32.mrf.mxu0 }
  0xf3   : > { %v440_v54 = vpack.c.bf16 %v429_v51, %v428_v50  ;;  %v406_v57 = vadd.f32 %v688_v13, %v405_v53  ;;  %v434_v1 = vmax.f32 %v414_v59, 0.0 }
  0xf4   : > { %v759_v56 = vpop.f32.mrf.mxu0 }
  0xf5   : > { %v417_v58 = vadd.f32 %v759_v56, %v688_v13  ;;  %772 = vmatprep.mubr.msk.bf16.mxu1 %vm467_vm1, %v440_v54  ;;  %v432_v63 = vmax.f32 %v406_v57, 0.0 }
  0xf6   : > { %v408_v60 = vpop.f32.mrf.mxu0  ;;  %773 = vmatmul.mubr.msk.bf16.gmra.mxu1 %vm467_vm1, %v441_v55 }
  0xf7   : > { %v409_v61 = vadd.f32 %v688_v13, %v408_v60  ;;  %v435_v62 = vmax.f32 %v417_v58, 0.0 }
  0xf9   : > { %v433_v0 = vmax.f32 %v409_v61, 0.0  ;;  %v443_v3 = vpack.c.bf16 %v435_v62, %v434_v1 }
  0xfb   : > { %v442_v2 = vpack.c.bf16 %v433_v0, %v432_v63 }
  0xfd   : > { %776 = vmatprep.mubr.msk.bf16.mxu1 %vm467_vm1, %v442_v2 }
  0xfe   : > { %777 = vmatmul.mubr.msk.bf16.gmra.mxu1 %vm467_vm1, %v443_v3 }
 0x1a6   : > { %v766_v5 = vpop.f32.mrf.mxu1 }
 0x1a7   : > { %v535_v6 = vadd.f32 %v766_v5, %v706_v4 }
 0x1a8   : > { %v526_v7 = vpop.f32.mrf.mxu1 }
 0x1a9   : > { %591 = vst [vmem:[%s1013_s6 + $0x10] sm:$0xff] %v535_v6  ;;  %v527_v8 = vadd.f32 %v706_v4, %v526_v7 }
 0x1aa   : > { %v767_v9 = vpop.f32.mrf.mxu1 }
 0x1ab   : > { %589 = vst [vmem:[%s1013_s6] sm:$0xff] %v527_v8  ;;  %v538_v10 = vadd.f32 %v767_v9, %v706_v4 }
 0x1ac   : > { %v529_v11 = vpop.f32.mrf.mxu1 }
 0x1ad   : > { %592 = vst [vmem:[%s1013_s6 + $0x18] sm:$0xff] %v538_v10  ;;  %v530_v12 = vadd.f32 %v706_v4, %v529_v11 }
 0x1ae   : > { %v770_v13 = vpop.f32.mrf.mxu1 }
 0x1af   : > { %590 = vst [vmem:[%s1013_s6 + $0x8] sm:$0xff] %v530_v12  ;;  %v551_v14 = vadd.f32 %v770_v13, %v706_v4 }
 0x1b0   : > { %v542_v15 = vpop.f32.mrf.mxu1 }
 0x1b1   : > { %595 = vst [vmem:[%s1013_s6 + $0x30] sm:$0xff] %v551_v14  ;;  %v543_v16 = vadd.f32 %v706_v4, %v542_v15 }
 0x1b2   : > { %v771_v17 = vpop.f32.mrf.mxu1 }
 0x1b3   : > { %593 = vst [vmem:[%s1013_s6 + $0x20] sm:$0xff] %v543_v16  ;;  %v554_v18 = vadd.f32 %v771_v17, %v706_v4 }
 0x1b4   : > { %v545_v19 = vpop.f32.mrf.mxu1 }
 0x1b5   : > { %596 = vst [vmem:[%s1013_s6 + $0x38] sm:$0xff] %v554_v18  ;;  %v546_v20 = vadd.f32 %v706_v4, %v545_v19 }
 0x1b6   : > { %v774_v21 = vpop.f32.mrf.mxu1 }
 0x1b7   : > { %594 = vst [vmem:[%s1013_s6 + $0x28] sm:$0xff] %v546_v20  ;;  %v567_v22 = vadd.f32 %v774_v21, %v706_v4 }
 0x1b8   : > { %v558_v23 = vpop.f32.mrf.mxu1 }
 0x1b9   : > { %599 = vst [vmem:[%s1013_s6 + $0x50] sm:$0xff] %v567_v22  ;;  %v559_v24 = vadd.f32 %v706_v4, %v558_v23 }
 0x1ba   : > { %v775_v25 = vpop.f32.mrf.mxu1 }
 0x1bb   : > { %597 = vst [vmem:[%s1013_s6 + $0x40] sm:$0xff] %v559_v24  ;;  %v570_v26 = vadd.f32 %v775_v25, %v706_v4 }
 0x1bc   : > { %v561_v27 = vpop.f32.mrf.mxu1 }
 0x1bd   : > { %600 = vst [vmem:[%s1013_s6 + $0x58] sm:$0xff] %v570_v26  ;;  %v562_v28 = vadd.f32 %v706_v4, %v561_v27 }
 0x1be   : > { %v778_v29 = vpop.f32.mrf.mxu1 }
 0x1bf   : > { %598 = vst [vmem:[%s1013_s6 + $0x48] sm:$0xff] %v562_v28  ;;  %v583_v30 = vadd.f32 %v778_v29, %v706_v4 }
 0x1c0   : > { %v574_v31 = vpop.f32.mrf.mxu1 }
 0x1c1   : > { %603 = vst [vmem:[%s1013_s6 + $0x70] sm:$0xff] %v583_v30  ;;  %v575_v32 = vadd.f32 %v706_v4, %v574_v31 }
 0x1c2   : > { %v779_v33 = vpop.f32.mrf.mxu1 }
 0x1c3   : > { %601 = vst [vmem:[%s1013_s6 + $0x60] sm:$0xff] %v575_v32  ;;  %v586_v34 = vadd.f32 %v779_v33, %v706_v4 }
 0x1c4   : > { %v577_v35 = vpop.f32.mrf.mxu1 }
 0x1c5   : > { %604 = vst [vmem:[%s1013_s6 + $0x78] sm:$0xff] %v586_v34  ;;  %v578_v36 = vadd.f32 %v706_v4, %v577_v35 }
 0x1c7   : > { %602 = vst [vmem:[%s1013_s6 + $0x68] sm:$0xff] %v578_v36 }
 0x1c8   : > { %845 = shalt.err (!%p842_p3)
}
 0x1c9   : > { %s846_s16 = scalar_lea.hbm %s1034_s11, 2048  ;;  %s850_s25 = scalar_lea.hbm %s1087_s5, 4096 }
 0x1ca   : > { %p847_p4 = scmp.ne.s32.totalorder %s1034_s11, %s846_s16  ;;  %p851_p9 = scmp.lt.s32.totalorder %s1034_s11, %s1087_s5 }
 0x1cb   : > { %p852_p10 = scmp.lt.s32.totalorder %s850_s25, %s846_s16 }
 0x1cc   : > { %p848_p7 = pnand %p847_p4, %p965_p5 }
 0x1cd   : > { %p853_p11 = por %p852_p10, %p851_p9 }
 0x1ce   : > { %p849_p8 = pneg %p848_p7 }
 0x1d0   : > { %p854_p12 = pnand %p853_p11, %p849_p8 }
 0x1d2   : > { %857 = shalt.err (!%p854_p12)
}
 0x1d3   : > { %s895_s6 = smov 128   ;;  %s896_s7 = smov 8  }
 0x1d4   : > { %780 = dma.vmem_to_hbm [thread:$0]  (%p965_p5), %s1036_s8, 2048, %s1034_s11, %s1042_s22, %s895_s6, %s895_s6, %s896_s7  }
 0x1d5 PF: > { %p786_p13 = scmp.ge.s32.totalorder %s892_s21, 2  ;;  %s634_s9 = sand.u32 1, %s880_s18  }
 0x1d6   : > { %s635_s10 = scalar_lea.sflag [#allocation3], %s634_s9 }
 0x1d7   : > { %p783_p0 = pnand %p786_p13, %p969_p6 }
 0x1d9   : > { %p784_p1 = pneg %p783_p0 }
 0x1db   : > { %875 = dma.done.wait (%p784_p1), %s635_s10, 2048  }
 0x1dc   : > { %877 = vsyncadd (%p784_p1), %s635_s10, 4294965248  ;;  %p15_p2 = scmp.ge.s32.totalorder %s952_s24, 4   ;;  %s1090_s18 = smov %s884_s19 }
 0x1dd   : > { %s1091_s19 = smov %s888_s20  ;;  %s1092_s20 = smov %s963_s27 }
 0x1de   : > { %s1093_s21 = smov %s952_s24  ;;  %17 = sbr.rel (!%p15_p2) target bundleno = 3 (0x3), region = 75 }
 0x1e3   :  { %640 = vsyncpa [#allocation3], 1 }
 0x1e4   :  { %642 = vsyncpa [#allocation3 + $0x1], 1 }

</bundles_post_ra>
